<compile_context>
chip_gen: v7x
topology: tpu7x:2x2x1
jax: 0.10.0
libtpu: 0.0.40
codegen_flags: <defaults>
</compile_context>

<pallas_src>
import functools

import jax
import jax.numpy as jnp
from jax.experimental import pallas as pl
from jax.experimental.pallas import tpu as pltpu

_HIDDEN = 64  # hidden width of the MLP (fixed by the module definition)


def _round_up(x, m):
    return (x + m - 1) // m * m


def _actor_kernel(x_ref, w1_ref, wr_ref, b_ref, out_ref, *, max_action, ee_pose):
    """One batch tile through the 4-layer MLP.

    x_ref  : [tb, input_num] f32
    w1_ref : [input_num, 64] bf16
    wr_ref : [3, 64, 64]     bf16  (fc2, fc3, action_out padded to 64 out-cols)
    b_ref  : [4, 64]         f32   (b1, b2, b3, b4 padded with zeros)
    out_ref: [tb, output_num] f32
    """
    on = out_ref.shape[-1]
    b = b_ref[...]                       # (4, 64) f32, resident
    b1 = b[0:1, :]
    b2 = b[1:2, :]
    b3 = b[2:3, :]
    b4 = b[3:4, :]

    x = x_ref[...].astype(jnp.bfloat16)
    h = jnp.dot(x, w1_ref[...], preferred_element_type=jnp.float32) + b1
    h = jnp.maximum(h, 0.0)
    h = jnp.dot(h.astype(jnp.bfloat16), wr_ref[0],
                preferred_element_type=jnp.float32) + b2
    h = jnp.maximum(h, 0.0)
    h = jnp.dot(h.astype(jnp.bfloat16), wr_ref[1],
                preferred_element_type=jnp.float32) + b3
    h = jnp.maximum(h, 0.0)
    a = jnp.dot(h.astype(jnp.bfloat16), wr_ref[2],
                preferred_element_type=jnp.float32) + b4
    a = a[:, :on]                        # only the real action columns
    if ee_pose:
        a = jnp.clip(max_action * a, -max_action, max_action)
    else:
        a = max_action * jnp.tanh(a)
    out_ref[...] = a.astype(out_ref.dtype)


def pack_actor_params(params, input_num, output_num):
    """Pack per-layer (W, b) into MXU-friendly buffers.

    Returns:
      w1     : [input_num, 64] bf16
      w_rest : [3, 64, 64]     bf16  (action_out zero-padded to 64 out-cols)
      biases : [4, 64]         f32   (b4 zero-padded; kept f32 for accuracy)
    W is stored [in_features, out_features].
    """
    w1, b1 = params["fc1"]
    w2, b2 = params["fc2"]
    w3, b3 = params["fc3"]
    w4, b4 = params["action_out"]
    assert w1.shape == (input_num, _HIDDEN)
    assert w2.shape == (_HIDDEN, _HIDDEN) and w3.shape == (_HIDDEN, _HIDDEN)
    assert w4.shape == (_HIDDEN, output_num)
    assert output_num <= _HIDDEN

    w1_p = w1.astype(jnp.bfloat16)
    w4_p = jnp.zeros((_HIDDEN, _HIDDEN), jnp.float32).at[:, :output_num].set(
        w4.astype(jnp.float32))
    w_rest = jnp.stack(
        [w2.astype(jnp.float32), w3.astype(jnp.float32), w4_p], axis=0
    ).astype(jnp.bfloat16)
    b4_p = jnp.zeros((_HIDDEN,), jnp.float32).at[:output_num].set(
        b4.astype(jnp.float32))
    biases = jnp.stack(
        [b1.astype(jnp.float32), b2.astype(jnp.float32),
         b3.astype(jnp.float32), b4_p], axis=0)
    return w1_p, w_rest, biases


def _choose_batch_tiling(B, batch_tile):
    """Pick (tile_rows, grid_steps)."""
    if B <= 512:
        # Tiny/medium batch: one step; this path is fixed-overhead bound anyway.
        tb = _round_up(max(B, 8), 8)
    else:
        # At least 2 parallel steps so both v7x TensorCores get work; cap tile
        # size so per-step VMEM stays small and steps stay load-balanced.
        n_steps = max(2, pl.cdiv(B, batch_tile))
        tb = _round_up(pl.cdiv(B, n_steps), 8)
    grid = pl.cdiv(B, tb)
    return tb, grid


def actor_forward(x, packed_params, *, output_num, max_action,
                  ee_pose=False, batch_tile=2048):
    """x: [B, input_num] float.  packed_params: output of pack_actor_params."""
    w1, w_rest, biases = packed_params
    B, input_num = x.shape
    assert w1.shape == (input_num, _HIDDEN)

    tb, grid = _choose_batch_tiling(B, batch_tile)

    kernel = functools.partial(
        _actor_kernel, max_action=float(max_action), ee_pose=bool(ee_pose))

    out = pl.pallas_call(
        kernel,
        out_shape=jax.ShapeDtypeStruct((B, output_num), jnp.float32),
        grid=(grid,),
        in_specs=[
            pl.BlockSpec((tb, input_num), lambda i: (i, 0)),     # batch tile
            pl.BlockSpec(w1.shape, lambda i: (0, 0)),            # resident weights
            pl.BlockSpec(w_rest.shape, lambda i: (0, 0, 0)),
            pl.BlockSpec(biases.shape, lambda i: (0, 0)),
        ],
        out_specs=pl.BlockSpec((tb, output_num), lambda i: (i, 0)),
        compiler_params=pltpu.CompilerParams(
            dimension_semantics=("parallel",)),
    )(x.astype(jnp.float32), w1, w_rest, biases)
    return out


def init_actor_params(key, input_num, output_num=4):
    """nn.Linear-style init (uniform +-1/sqrt(fan_in)); W stored [in, out]."""
    dims = [(input_num, _HIDDEN), (_HIDDEN, _HIDDEN), (_HIDDEN, _HIDDEN),
            (_HIDDEN, output_num)]
    names = ["fc1", "fc2", "fc3", "action_out"]
    params = {}
    for name, (fan_in, fan_out) in zip(names, dims):
        key, kw, kb = jax.random.split(key, 3)
        bound = 1.0 / jnp.sqrt(fan_in)
        w = jax.random.uniform(kw, (fan_in, fan_out), jnp.float32, -bound, bound)
        b = jax.random.uniform(kb, (fan_out,), jnp.float32, -bound, bound)
        params[name] = (w, b)
    return params


def _reference(x, params, max_action, ee_pose):
    h = jnp.maximum(x @ params["fc1"][0] + params["fc1"][1], 0.0)
    h = jnp.maximum(h @ params["fc2"][0] + params["fc2"][1], 0.0)
    h = jnp.maximum(h @ params["fc3"][0] + params["fc3"][1], 0.0)
    a = h @ params["action_out"][0] + params["action_out"][1]
    if ee_pose:
        return jnp.clip(max_action * a, -max_action, max_action)
    return max_action * jnp.tanh(a)


if __name__ == "__main__":
    key = jax.random.PRNGKey(0)
    key, kx, kxl = jax.random.split(key, 3)

    input_num = 16        # e.g. env observation + goal
    output_num = 4
    max_action = 1.0

    params = init_actor_params(key, input_num, output_num)
    packed = pack_actor_params(params, input_num, output_num)
    packed = tuple(jax.block_until_ready(p) for p in packed)

    # bf16 matmul operands -> loosened tolerance vs. the f32 reference.
    TOL = 5e-2

    # Small batch, tanh-squashed path (module default).
    x = jax.random.normal(kx, (8, input_num), jnp.float32)
    actions = jax.block_until_ready(
        actor_forward(x, packed, output_num=output_num,
                      max_action=max_action, ee_pose=False))
    assert actions.shape == (8, output_num)
    assert jnp.allclose(actions, _reference(x, params, max_action, False), atol=TOL)

    # ee_pose=True (clamp) branch.
    actions_ee = jax.block_until_ready(
        actor_forward(x, packed, output_num=output_num,
                      max_action=max_action, ee_pose=True))
    assert actions_ee.shape == (8, output_num)
    assert jnp.allclose(actions_ee, _reference(x, params, max_action, True), atol=TOL)

    # Non-multiple-of-8 batch exercises boundary-masked blocks.
    x_small = x[:3]
    a_small = jax.block_until_ready(
        actor_forward(x_small, packed, output_num=output_num,
                      max_action=max_action, ee_pose=False))
    assert a_small.shape == (3, output_num)
    assert jnp.allclose(a_small, _reference(x_small, params, max_action, False), atol=TOL)

    # Larger batch exercises the >=2-step "parallel" grid + a partial last tile.
    x_large = jax.random.normal(kxl, (600, input_num), jnp.float32)
    a_large = jax.block_until_ready(
        actor_forward(x_large, packed, output_num=output_num,
                      max_action=max_action, ee_pose=False))
    assert a_large.shape == (600, output_num)
    assert jnp.allclose(a_large, _reference(x_large, params, max_action, False), atol=TOL)

    print("KERNEL_OK")
</pallas_src>

<mosaic_0001>
module attributes {stable_mosaic.version = 11 : i64} {
  func.func @_actor_kernel(%arg0: i32, %arg1: memref<8x16xf32, #tpu.memory_space<vmem>>, %arg2: memref<16x64xbf16, #tpu.memory_space<vmem>>, %arg3: memref<3x64x64xbf16, #tpu.memory_space<vmem>>, %arg4: memref<4x64xf32, #tpu.memory_space<vmem>>, %arg5: memref<8x4xf32, #tpu.memory_space<vmem>>) attributes {dimension_semantics = [#tpu.dimension_semantics<parallel>], iteration_bounds = array<i64: 1>, scalar_prefetch = 0 : i64, scratch_operands = 0 : i64, tpu.core_type = #tpu.core_type<tc>, window_params = [{transform_indices = @transform_0, window_bounds = array<i64: 8, 16>}, {pipeline_mode = #tpu.pipeline_mode<synchronous>, transform_indices = @transform_1, window_bounds = array<i64: 16, 64>}, {pipeline_mode = #tpu.pipeline_mode<synchronous>, transform_indices = @transform_2, window_bounds = array<i64: 3, 64, 64>}, {pipeline_mode = #tpu.pipeline_mode<synchronous>, transform_indices = @transform_3, window_bounds = array<i64: 4, 64>}, {transform_indices = @transform_4, window_bounds = array<i64: 8, 4>}]} {
    %c0 = arith.constant 0 : index
    %c0_0 = arith.constant 0 : index
    %0 = vector.load %arg4[%c0, %c0_0] : memref<4x64xf32, #tpu.memory_space<vmem>>, vector<4x64xf32>
    %1 = vector.extract_strided_slice %0 {offsets = [0, 0], sizes = [1, 64], strides = [1, 1]} : vector<4x64xf32> to vector<1x64xf32>
    %2 = vector.extract_strided_slice %0 {offsets = [1, 0], sizes = [1, 64], strides = [1, 1]} : vector<4x64xf32> to vector<1x64xf32>
    %3 = vector.extract_strided_slice %0 {offsets = [2, 0], sizes = [1, 64], strides = [1, 1]} : vector<4x64xf32> to vector<1x64xf32>
    %4 = vector.extract_strided_slice %0 {offsets = [3, 0], sizes = [1, 64], strides = [1, 1]} : vector<4x64xf32> to vector<1x64xf32>
    %c0_1 = arith.constant 0 : index
    %c0_2 = arith.constant 0 : index
    %5 = vector.load %arg1[%c0_1, %c0_2] : memref<8x16xf32, #tpu.memory_space<vmem>>, vector<8x16xf32>
    %6 = arith.truncf %5 : vector<8x16xf32> to vector<8x16xbf16>
    %c0_3 = arith.constant 0 : index
    %c0_4 = arith.constant 0 : index
    %7 = vector.load %arg2[%c0_3, %c0_4] : memref<16x64xbf16, #tpu.memory_space<vmem>>, vector<16x64xbf16>
    %cst = arith.constant dense<0.000000e+00> : vector<8x64xf32>
    %8 = tpu.matmul %6, %7, %cst {dimension_numbers = #tpu.dot_dimension_numbers<[1], [0], [0], [1], [0, 0, 1, 1], [], []>} : vector<8x16xbf16>, vector<16x64xbf16>, vector<8x64xf32> -> vector<8x64xf32>
    %9 = vector.broadcast %1 : vector<1x64xf32> to vector<8x64xf32>
    %10 = arith.addf %8, %9 : vector<8x64xf32>
    %cst_5 = arith.constant 0.000000e+00 : f32
    %11 = vector.broadcast %cst_5 : f32 to vector<8x64xf32>
    %12 = arith.maximumf %10, %11 : vector<8x64xf32>
    %13 = arith.truncf %12 : vector<8x64xf32> to vector<8x64xbf16>
    %c0_6 = arith.constant 0 : index
    %c0_7 = arith.constant 0 : index
    %c0_8 = arith.constant 0 : index
    %14 = vector.load %arg3[%c0_6, %c0_7, %c0_8] : memref<3x64x64xbf16, #tpu.memory_space<vmem>>, vector<1x64x64xbf16>
    %15 = vector.shape_cast %14 : vector<1x64x64xbf16> to vector<64x64xbf16>
    %cst_9 = arith.constant dense<0.000000e+00> : vector<8x64xf32>
    %16 = tpu.matmul %13, %15, %cst_9 {dimension_numbers = #tpu.dot_dimension_numbers<[1], [0], [0], [1], [0, 0, 1, 1], [], []>} : vector<8x64xbf16>, vector<64x64xbf16>, vector<8x64xf32> -> vector<8x64xf32>
    %17 = vector.broadcast %2 : vector<1x64xf32> to vector<8x64xf32>
    %18 = arith.addf %16, %17 : vector<8x64xf32>
    %cst_10 = arith.constant 0.000000e+00 : f32
    %19 = vector.broadcast %cst_10 : f32 to vector<8x64xf32>
    %20 = arith.maximumf %18, %19 : vector<8x64xf32>
    %21 = arith.truncf %20 : vector<8x64xf32> to vector<8x64xbf16>
    %c1 = arith.constant 1 : index
    %c0_11 = arith.constant 0 : index
    %c0_12 = arith.constant 0 : index
    %22 = vector.load %arg3[%c1, %c0_11, %c0_12] : memref<3x64x64xbf16, #tpu.memory_space<vmem>>, vector<1x64x64xbf16>
    %23 = vector.shape_cast %22 : vector<1x64x64xbf16> to vector<64x64xbf16>
    %cst_13 = arith.constant dense<0.000000e+00> : vector<8x64xf32>
    %24 = tpu.matmul %21, %23, %cst_13 {dimension_numbers = #tpu.dot_dimension_numbers<[1], [0], [0], [1], [0, 0, 1, 1], [], []>} : vector<8x64xbf16>, vector<64x64xbf16>, vector<8x64xf32> -> vector<8x64xf32>
    %25 = vector.broadcast %3 : vector<1x64xf32> to vector<8x64xf32>
    %26 = arith.addf %24, %25 : vector<8x64xf32>
    %cst_14 = arith.constant 0.000000e+00 : f32
    %27 = vector.broadcast %cst_14 : f32 to vector<8x64xf32>
    %28 = arith.maximumf %26, %27 : vector<8x64xf32>
    %29 = arith.truncf %28 : vector<8x64xf32> to vector<8x64xbf16>
    %c2 = arith.constant 2 : index
    %c0_15 = arith.constant 0 : index
    %c0_16 = arith.constant 0 : index
    %30 = vector.load %arg3[%c2, %c0_15, %c0_16] : memref<3x64x64xbf16, #tpu.memory_space<vmem>>, vector<1x64x64xbf16>
    %31 = vector.shape_cast %30 : vector<1x64x64xbf16> to vector<64x64xbf16>
    %cst_17 = arith.constant dense<0.000000e+00> : vector<8x64xf32>
    %32 = tpu.matmul %29, %31, %cst_17 {dimension_numbers = #tpu.dot_dimension_numbers<[1], [0], [0], [1], [0, 0, 1, 1], [], []>} : vector<8x64xbf16>, vector<64x64xbf16>, vector<8x64xf32> -> vector<8x64xf32>
    %33 = vector.broadcast %4 : vector<1x64xf32> to vector<8x64xf32>
    %34 = arith.addf %32, %33 : vector<8x64xf32>
    %35 = vector.extract_strided_slice %34 {offsets = [0, 0], sizes = [8, 4], strides = [1, 1]} : vector<8x64xf32> to vector<8x4xf32>
    %36 = math.tanh %35 : vector<8x4xf32>
    %cst_18 = arith.constant 1.000000e+00 : f32
    %37 = vector.broadcast %cst_18 : f32 to vector<8x4xf32>
    %38 = arith.mulf %37, %36 : vector<8x4xf32>
    %c0_19 = arith.constant 0 : index
    %c0_20 = arith.constant 0 : index
    %39 = vector.load %arg5[%c0_19, %c0_20] : memref<8x4xf32, #tpu.memory_space<vmem>>, vector<8x4xf32>
    tpu.vector_store %arg5[%c0_19, %c0_20], %38 {strides = array<i32>} : memref<8x4xf32, #tpu.memory_space<vmem>>, vector<8x4xf32>,
    return
  }
  func.func @transform_0(%arg0: i32) -> (i32, i32) {
    %c0_i32 = arith.constant 0 : i32
    %c0_i32_0 = arith.constant 0 : i32
    return %arg0, %c0_i32 : i32, i32
  }
  func.func @transform_1(%arg0: i32) -> (i32, i32) {
    %c0_i32 = arith.constant 0 : i32
    %c0_i32_0 = arith.constant 0 : i32
    %c0_i32_1 = arith.constant 0 : i32
    return %c0_i32, %c0_i32_0 : i32, i32
  }
  func.func @transform_2(%arg0: i32) -> (i32, i32, i32) {
    %c0_i32 = arith.constant 0 : i32
    %c0_i32_0 = arith.constant 0 : i32
    %c0_i32_1 = arith.constant 0 : i32
    %c0_i32_2 = arith.constant 0 : i32
    return %c0_i32, %c0_i32_0, %c0_i32_1 : i32, i32, i32
  }
  func.func @transform_3(%arg0: i32) -> (i32, i32) {
    %c0_i32 = arith.constant 0 : i32
    %c0_i32_0 = arith.constant 0 : i32
    %c0_i32_1 = arith.constant 0 : i32
    return %c0_i32, %c0_i32_0 : i32, i32
  }
  func.func @transform_4(%arg0: i32) -> (i32, i32) {
    %c0_i32 = arith.constant 0 : i32
    %c0_i32_0 = arith.constant 0 : i32
    return %arg0, %c0_i32 : i32, i32
  }
}

</mosaic_0001>

<bundles_post_ra>
// kernel: tpu_custom_call.1
= control target key start
LH: loop header
LB: loop body
LE: loop exit
PB: predicated region body
PF: predicated region fallthrough
CT: control target
= control target key end

     0   :  { %9 = vsyncpa [#allocation3], 0  ;;  %s643_s0 = inlined_call_operand.hbm [shape: f32[8,16], index: 0, kind: input, shape index: {}]   ;;  %s644_s1 = inlined_call_operand.hbm [shape: bf16[16,64], index: 1, kind: input, shape index: {}]   ;;  %s645_s2 = inlined_call_operand.hbm [shape: bf16[3,64,64], index: 2, kind: input, shape index: {}]   ;;  %s646_s3 = inlined_call_operand.vmem [shape: f32[4,64], index: 3, kind: input, shape index: {}]   ;;  %s647_s4 = inlined_call_operand.vmem [shape: f32[8,4], index: 4, kind: output, shape index: {}]  }
   0x1   :  { %10 = vsyncpa [#allocation5], 0  ;;  %s539_s15 = smov [#allocation4]   ;;  %s469_s19 = scalar_lea.hbm %s644_s1, 128 }
   0x2   :  { %s26_s16 = sshll.u32 %s539_s15, 4  ;;  %p470_p0 = scmp.ne.s32.totalorder %s644_s1, %s469_s19  ;;  %s27_s16 = int_to_ptr.vmem [resolvable:$true] %s26_s16 }
   0x3   :  { %p473_p1 = scmp.lt.u32.totalorder %s469_s19, %s644_s1 }
   0x5   :  { %p475_p2 = pnand %p473_p1, %p470_p0 }
   0x7   :  { %478 = shalt.err (!%p475_p2)
}
   0x8   :  { %s479_s24 = scalar_lea.vmem %s27_s16, 128  ;;  %p484_p4 = scmp.lt.s32.totalorder %s27_s16, %s27_s16 }
   0x9   :  { %p480_p3 = scmp.ne.s32.totalorder %s27_s16, %s479_s24  ;;  %p485_p5 = scmp.lt.s32.totalorder %s479_s24, %s479_s24 }
   0xb   :  { %p486_p6 = por %p485_p5, %p484_p4 }
   0xd   :  { %p487_p7 = pnand %p486_p6, %p480_p3 }
   0xf   :  { %490 = shalt.err (!%p487_p7)
}
  0x10   :  { %s540_s25 = smov 64   ;;  %s541_s26 = smov 4  }
  0x11   :  { %32 = dma.hbm_to_vmem [thread:$0]  %s644_s1, 128, %s27_s16, [#allocation5], %s540_s25, %s540_s25, %s541_s26  }
  0x12   :  { %s542_s29 = smov [#allocation2]   ;;  %s543_s5 = smov [#allocation6]  }
  0x13   :  { %s17_s30 = sshll.u32 %s542_s29, 4  ;;  %s38_s6 = sshll.u32 %s543_s5, 4  ;;  %s18_s30 = int_to_ptr.vmem [resolvable:$true] %s17_s30  ;;  %s39_s6 = int_to_ptr.vmem [resolvable:$true] %s38_s6 }
  0x14   :  { %s491_s9 = scalar_lea.hbm %s643_s0, 128 }
  0x15   :  { %p492_p8 = scmp.ne.s32.totalorder %s643_s0, %s491_s9  ;;  %p495_p9 = scmp.lt.u32.totalorder %s491_s9, %s643_s0 }
  0x17   :  { %p497_p10 = pnand %p495_p9, %p492_p8 }
  0x19   :  { %500 = shalt.err (!%p497_p10)
}
  0x1a   :  { %s501_s1 = scalar_lea.vmem %s18_s30, 128  ;;  %p506_p12 = scmp.lt.s32.totalorder %s18_s30, %s18_s30 }
  0x1b   :  { %p502_p11 = scmp.ne.s32.totalorder %s18_s30, %s501_s1  ;;  %p507_p13 = scmp.lt.s32.totalorder %s501_s1, %s501_s1 }
  0x1d   :  { %p508_p0 = por %p507_p13, %p506_p12 }
  0x1f   :  { %p509_p1 = pnand %p508_p0, %p502_p11 }
  0x21   :  { %512 = shalt.err (!%p509_p1)
}
  0x22   :  { %20 = dma.hbm_to_vmem [thread:$0]  %s643_s0, 128, %s18_s30, [#allocation3]  }
  0x23   :  { %s513_s18 = scalar_lea.hbm %s645_s2, 1536 }
  0x24   :  { %p514_p2 = scmp.ne.s32.totalorder %s645_s2, %s513_s18  ;;  %p517_p3 = scmp.lt.u32.totalorder %s513_s18, %s645_s2 }
  0x26   :  { %p519_p4 = pnand %p517_p3, %p514_p2 }
  0x28   :  { %522 = shalt.err (!%p519_p4)
}
  0x29   :  { %s523_s23 = scalar_lea.vmem %s39_s6, 1536  ;;  %p528_p6 = scmp.lt.s32.totalorder %s39_s6, %s39_s6 }
  0x2a   :  { %p524_p5 = scmp.ne.s32.totalorder %s39_s6, %s523_s23  ;;  %p529_p7 = scmp.lt.s32.totalorder %s523_s23, %s523_s23 }
  0x2c   :  { %p530_p8 = por %p529_p7, %p528_p6 }
  0x2e   :  { %p531_p9 = pnand %p530_p8, %p524_p5 }
  0x30   :  { %534 = shalt.err (!%p531_p9)
}
  0x31   :  { %44 = dma.hbm_to_vmem [thread:$0]  %s645_s2, 1536, %s39_s6, [#allocation5], %s540_s25, %s540_s25, %s541_s26  }
  0x32   :  { %535 = dma.done.wait [#allocation3], 128  }
  0x33   :  { %536 = vsyncadd [#allocation3], 4294967168 }
  0x34   :  { %537 = dma.done.wait [#allocation5], 1664  }
  0x35   :  { %538 = vsyncadd [#allocation5], 4294965632  ;;  %v544_v0 = vmov 0.0   ;;  %vm545_vm0 = vmmov 0   ;;  %v454_v1 = vld [vmem:[#allocation4] sm:$0xff]   ;;  %v58_v2 = vld [vmem:[#allocation2] sm:$0xff]  ;;  %v62_v10 = vlaneseq }
  0x36   :  { %405 = vmatprep.subr.bf16.mxu0 %v544_v0  ;;  %407 = vmatprep.mubr.msk.bf16.mxu0 %vm545_vm0, %v544_v0  ;;  %v59_v3 = vpack.c.bf16 %v58_v2, %v58_v2  ;;  %vm72_vm1 = vcmask 130048   ;;  %v455_v4 = vld [vmem:[#allocation6] sm:$0xff]   ;;  %v456_v5 = vld [vmem:[#allocation6 + $0x8] sm:$0xff]   ;;  %v457_v6 = vld [vmem:[#allocation6 + $0x10] sm:$0xff]   ;;  %vm154_vm2 = vcmask 523264   ;;  %vm363_vm3 = vcmask 31744  }
  0x37   :  { %411 = vmatprep.subr.bf16.mxu1 %v544_v0  ;;  %419 = vmatprep.mubr.msk.bf16.mxu1 %vm545_vm0, %v544_v0  ;;  %v458_v7 = vld [vmem:[#allocation6 + $0x18] sm:$0xff]   ;;  %v459_v8 = vld [vmem:[#allocation6 + $0x20] sm:$0xff]   ;;  %v460_v9 = vld [vmem:[#allocation6 + $0x28] sm:$0xff]   ;;  %v63_v11 = vshrl.u32 %v62_v10, 7 }
  0x38   :  { %406 = vmatpush3.bf16.msra.mxu0 %v454_v1  ;;  %412 = vmatpush3.bf16.msra.mxu1 %v455_v4  ;;  %v57_v13 = vld [vmem:[%s646_s3] sm:$0xf]  ;;  %v461_v22 = vld [vmem:[#allocation6 + $0x30] sm:$0xff]   ;;  %v462_v23 = vld [vmem:[#allocation6 + $0x38] sm:$0xff]  }
  0x39   :  { %423 = vmatprep.subr.bf16.mxu0 %v544_v0  ;;  %413 = vmatprep.subr.bf16.mxu1 %v544_v0  ;;  %v64_v12 = vsub.s32 0, %v63_v11  ;;  %v463_v24 = vld [vmem:[#allocation6 + $0x40] sm:$0xff]   ;;  %v464_v25 = vld [vmem:[#allocation6 + $0x48] sm:$0xff]   ;;  %v128_v26 = vsub.s32 1, %v63_v11  ;;  %v465_v35 = vld [vmem:[#allocation6 + $0x50] sm:$0xff]   ;;  %v211_v37 = vsub.s32 2, %v63_v11 }
  0x3a   :  { %v466_v36 = vld [vmem:[#allocation6 + $0x58] sm:$0xff]   ;;  %v293_v46 = vsub.s32 3, %v63_v11 }
  0x3b   :  { %408 = vmatmul.mubr.msk.bf16.vlgmr.msra.gmra.mrb[0].mxu0 %vm72_vm1, %v59_v3  ;;  %v65_v14 = vrot.slane %v57_v13, %v64_v12  ;;  %v129_v27 = vrot.slane %v57_v13, %v128_v26  ;;  %v212_v38 = vrot.slane %v57_v13, %v211_v37 }
  0x3c   :  { %431 = vmatprep.mubr.msk.bf16.mxu0 %vm545_vm0, %v544_v0  ;;  %414 = vmatpush3.bf16.msra.mxu1 %v456_v5  ;;  %v294_v47 = vrot.slane %v57_v13, %v293_v46 }
  0x3d   :  { %415 = vmatprep.subr.bf16.mxu1 %v544_v0  ;;  %424 = vmatpush3.bf16.msra.mxu0 %v459_v8 }
  0x3e   :  { %425 = vmatprep.subr.bf16.mxu0 %v544_v0 }
  0x40   :  { %416 = vmatpush3.bf16.msra.mxu1 %v457_v6 }
  0x41   :  { %417 = vmatprep.subr.bf16.mxu1 %v544_v0  ;;  %426 = vmatpush3.bf16.msra.mxu0 %v460_v9 }
  0x42   :  { %427 = vmatprep.subr.bf16.mxu0 %v544_v0 }
  0x44   :  { %418 = vmatpush3.bf16.msra.mxu1 %v458_v7 }
  0x45   :  { %435 = vmatprep.subr.bf16.mxu1 %v544_v0  ;;  %428 = vmatpush3.bf16.msra.mxu0 %v461_v22 }
  0x46   :  { %429 = vmatprep.subr.bf16.mxu0 %v544_v0 }
  0x49   :  { %430 = vmatpush3.bf16.msra.mxu0 %v462_v23 }
 0x10e   :  { %v110_v15 = vpop.f32.mrb[0].mxu0 }
 0x10f   :  { %v111_v16 = vadd.f32 %v110_v15, %v65_v14  ;;  %v409_v17 = vpop.f32.mrb[1].mxu0 }
 0x110   :  { %v113_v18 = vpop.f32.mrb[2].mxu0 }
 0x111   :  { %v116_v19 = vmax.f32 %v111_v16, 0.0  ;;  %v410_v20 = vpop.f32.mrb[3].mxu0 }
 0x113   :  { %v117_v21 = vpack.c.bf16 %v116_v19, %v116_v19 }
 0x115   :  { %420 = vmatmul.mubr.msk.bf16.vlgmr.msra.gmra.mrb[0].mxu1 %vm154_vm2, %v117_v21 }
 0x116   :  { %443 = vmatprep.mubr.msk.bf16.mxu1 %vm545_vm0, %v544_v0  ;;  %436 = vmatpush3.bf16.msra.mxu1 %v463_v24 }
 0x117   :  { %437 = vmatprep.subr.bf16.mxu1 %v544_v0 }
 0x11a   :  { %438 = vmatpush3.bf16.msra.mxu1 %v464_v25 }
 0x11b   :  { %439 = vmatprep.subr.bf16.mxu1 %v544_v0 }
 0x11e   :  { %440 = vmatpush3.bf16.msra.mxu1 %v465_v35 }
 0x11f   :  { %441 = vmatprep.subr.bf16.mxu1 %v544_v0 }
 0x122   :  { %442 = vmatpush3.bf16.msra.mxu1 %v466_v36 }
 0x1e8   :  { %v192_v28 = vpop.f32.mrb[0].mxu1 }
 0x1e9   :  { %v193_v29 = vadd.f32 %v192_v28, %v129_v27  ;;  %v421_v30 = vpop.f32.mrb[1].mxu1 }
 0x1ea   :  { %v195_v31 = vpop.f32.mrb[2].mxu1 }
 0x1eb   :  { %v198_v32 = vmax.f32 %v193_v29, 0.0  ;;  %v422_v33 = vpop.f32.mrb[3].mxu1 }
 0x1ed   :  { %v199_v34 = vpack.c.bf16 %v198_v32, %v198_v32 }
 0x1ef   :  { %432 = vmatmul.mubr.msk.bf16.vlgmr.msra.gmra.mrb[4].mxu0 %vm154_vm2, %v199_v34 }
 0x2c2   :  { %v274_v39 = vpop.f32.mrb[4].mxu0 }
 0x2c3   :  { %v275_v40 = vadd.f32 %v274_v39, %v212_v38  ;;  %v433_v41 = vpop.f32.mrb[5].mxu0 }
 0x2c4   :  { %v277_v42 = vpop.f32.mrb[6].mxu0 }
 0x2c5   :  { %v280_v43 = vmax.f32 %v275_v40, 0.0  ;;  %v434_v44 = vpop.f32.mrb[7].mxu0 }
 0x2c7   :  { %v281_v45 = vpack.c.bf16 %v280_v43, %v280_v43 }
 0x2c9   :  { %444 = vmatmul.mubr.msk.bf16.vlgmr.msra.gmra.mrb[4].mxu1 %vm154_vm2, %v281_v45 }
 0x39c   :  { %v356_v48 = vpop.f32.mrb[4].mxu1 }
 0x39d   :  { %v357_v49 = vadd.f32 %v356_v48, %v294_v47  ;;  %v445_v50 = vpop.f32.mrb[5].mxu1 }
 0x39e   :  { %v359_v51 = vpop.f32.mrb[6].mxu1 }
 0x39f   :  { %467 = vtanh.f32 %v357_v49  ;;  %v446_v52 = vpop.f32.mrb[7].mxu1 }
 0x3a9   :  { %v468_v53 = vpop.eup %467 }
 0x3aa   :  { %364 = vst.msk [vmem:[%s647_s4] sm:$0xff] %vm363_vm3, %v468_v53 }
 0x3ab   :  { %369 = vsyncpa [#allocation3], 1 }
 0x3ac   :  { %370 = vsyncpa [#allocation5], 1 }

</bundles_post_ra>
